<compile_context>
chip_gen: v7x
topology: tpu7x:2x2x1
jax: 0.10.0
libtpu: 0.0.40
codegen_flags: <defaults>
</compile_context>

<pallas_src>
import functools

import jax
import jax.numpy as jnp
from jax.experimental import pallas as pl
from jax.experimental.pallas import tpu as pltpu

_MiB = 1024 * 1024


def _round_up(x, m):
    return ((x + m - 1) // m) * m


def _pad_dim(d):
    # Lane-dense padding. Small dims: multiple of 128 (optimal for v5e's
    # 4x128x128 MXU, minimal zero-work). Larger dims: multiple of 256 so the
    # 2x256x256 MXU on v6e/v7x runs full-width (relative padding <= ~20%).
    if d > 512:
        return _round_up(d, 256)
    return _round_up(d, 128)


def _choose_tm(n_rows):
    # Prefer large row tiles (amortize ~0.35us/grid-step, deeper M per MXU
    # pass) but keep >=2 grid steps when possible so dimension_semantics=
    # ("parallel",) can shard rows across both v7x TensorCores.
    for tm in (512, 256, 128):
        if pl.cdiv(n_rows, tm) >= 2:
            return tm
    return 128


def _vmem_budget_bytes():
    # Generation-aware scoped-VMEM budget: ~3/4 of physical VMEM (128 MiB on
    # v5e/v6e, 64 MiB on v7x), capped at 100 MiB.  Fallback is safe on every
    # generation if the hardware query is unavailable.
    try:
        cap = int(pltpu.get_tpu_info().vmem_capacity_bytes)
    except Exception:
        cap = 64 * _MiB
    return min((cap * 3) // 4, 100 * _MiB)


def _fused_mlp_kernel(x_ref, *refs, num_layers):
    """Whole MLP on one row tile.

    x_ref:          (tm, in_pad)        VMEM, compute dtype (bf16)
    refs[:L]        (din_pad, dout_pad) VMEM-resident per-layer weights (bf16)
    refs[L:2L]      (1, dout_pad)       VMEM-resident per-layer biases (f32)
    refs[2L]        (tm, out_pad)       output tile
    """
    w_refs = refs[:num_layers]
    b_refs = refs[num_layers:2 * num_layers]
    o_ref = refs[2 * num_layers]

    h = x_ref[...]                                  # bf16 activations
    for l in range(num_layers):                     # static unroll (shallow MLP)
        acc = jnp.dot(h, w_refs[l][...],
                      preferred_element_type=jnp.float32) + b_refs[l][...]
        if l != num_layers - 1:
            acc = jnp.maximum(acc, 0.0)             # ReLU; dropout = identity
            h = acc.astype(x_ref.dtype)             # back to bf16 for next MXU pass
        else:
            h = acc
    o_ref[...] = h.astype(o_ref.dtype)


def pad_mlp_params(weights, biases, compute_dtype=jnp.bfloat16):
    """Per-layer zero-padding of (din, dout) to lane-dense widths; bf16 weights."""
    padded_w, padded_b = [], []
    for w, b in zip(weights, biases):
        din, dout = w.shape
        dp_in, dp_out = _pad_dim(din), _pad_dim(dout)
        wp = jnp.zeros((dp_in, dp_out), compute_dtype)
        wp = wp.at[:din, :dout].set(w.astype(compute_dtype))
        bp = jnp.zeros((1, dp_out), jnp.float32)
        bp = bp.at[0, :dout].set(b.astype(jnp.float32))
        padded_w.append(wp)
        padded_b.append(bp)
    return padded_w, padded_b


def fused_mlp_forward(x, padded_weights, padded_biases, out_dim, *,
                      tm=None, compute_dtype=jnp.bfloat16, out_dtype=None):
    """x: [N, input_dim]; padded_weights[l]: [din_pad_l, dout_pad_l] (bf16);
    padded_biases[l]: [1, dout_pad_l] (f32).  Returns [N, out_dim] (x.dtype)."""
    n, in_dim = x.shape
    num_layers = len(padded_weights)
    in_pad = padded_weights[0].shape[0]
    out_pad = padded_weights[-1].shape[1]
    out_dtype = out_dtype or x.dtype
    c_bytes = jnp.dtype(compute_dtype).itemsize
    o_bytes = jnp.dtype(out_dtype).itemsize

    layer_shapes = [w.shape for w in padded_weights]
    w_bytes = sum(a * b for a, b in layer_shapes) * c_bytes
    bias_bytes = sum(b.shape[1] for b in padded_biases) * 4
    max_pad = max([in_pad, out_pad] + [d for s in layer_shapes for d in s])

    budget = _vmem_budget_bytes()
    tm_eff = int(tm) if tm is not None else _choose_tm(n)

    def vmem_est(t):
        return (w_bytes + bias_bytes                    # single-copy residents
                + 2 * t * in_pad * c_bytes              # double-buffered x tile
                + 2 * t * out_pad * o_bytes             # double-buffered out tile
                + 2 * t * max_pad * (4 + c_bytes))      # live f32 acc + bf16 recast

    while vmem_est(tm_eff) > budget and tm_eff > 128:
        tm_eff //= 2
    if vmem_est(tm_eff) > budget:
        # TODO(synk): K-tiled streamed-weight path instead of erroring out.
        raise ValueError(
            f"resident weight stack needs ~{vmem_est(tm_eff) / _MiB:.1f} MiB "
            f"VMEM, budget {budget / _MiB:.1f} MiB; weight streaming required")

    n_pad = _round_up(max(n, 1), tm_eff)
    x_p = jnp.zeros((n_pad, in_pad), compute_dtype)
    x_p = x_p.at[:n, :in_dim].set(x.astype(compute_dtype))

    flops = sum(2 * n_pad * a * b for a, b in layer_shapes)
    bytes_accessed = (n_pad * in_pad * c_bytes + n_pad * out_pad * o_bytes
                      + w_bytes + bias_bytes)

    resident = pl.BlockSpec(memory_space=pltpu.MemorySpace.VMEM)
    kernel = functools.partial(_fused_mlp_kernel, num_layers=num_layers)

    out_p = pl.pallas_call(
        kernel,
        out_shape=jax.ShapeDtypeStruct((n_pad, out_pad), out_dtype),
        grid_spec=pltpu.PrefetchScalarGridSpec(
            num_scalar_prefetch=0,
            grid=(n_pad // tm_eff,),
            in_specs=[pl.BlockSpec((tm_eff, in_pad), lambda i: (i, 0))]
                     + [resident] * (2 * num_layers),
            out_specs=pl.BlockSpec((tm_eff, out_pad), lambda i: (i, 0)),
        ),
        compiler_params=pltpu.CompilerParams(
            dimension_semantics=("parallel",),
            vmem_limit_bytes=int(budget),
        ),
        cost_estimate=pl.CostEstimate(
            flops=flops, transcendentals=0, bytes_accessed=bytes_accessed),
    )(x_p, *padded_weights, *padded_biases)

    return out_p[:n, :out_dim]


class PallasMLP:
    """Mirrors PyTorch MLP forward with norm_type='none', eval-mode dropout."""

    def __init__(self, num_layers, input_dim, hidden_dim, output_dim, key,
                 compute_dtype=jnp.bfloat16):
        self.num_layers = num_layers
        self.output_dim = output_dim
        self.compute_dtype = compute_dtype
        self.params = []
        dims = ([(input_dim, output_dim)] if num_layers == 1 else
                [(input_dim, hidden_dim)] +
                [(hidden_dim, hidden_dim)] * (num_layers - 2) +
                [(hidden_dim, output_dim)])
        for (din, dout) in dims:
            key, kw, kb = jax.random.split(key, 3)
            # PyTorch nn.Linear default init: U(-1/sqrt(fan_in), 1/sqrt(fan_in))
            bound = 1.0 / (din ** 0.5)
            w = jax.random.uniform(kw, (din, dout), jnp.float32, -bound, bound)
            b = jax.random.uniform(kb, (dout,), jnp.float32, -bound, bound)
            self.params.append((w, b))
        # Hoisted out of the per-call path: padded bf16 weight/bias stacks
        # built once at construction.
        self.padded_w, self.padded_b = pad_mlp_params(
            [w for w, _ in self.params], [b for _, b in self.params],
            compute_dtype=compute_dtype)
        self._forward = jax.jit(functools.partial(
            fused_mlp_forward, out_dim=output_dim, compute_dtype=compute_dtype))

    def __call__(self, feats):
        return self._forward(feats, self.padded_w, self.padded_b)


if __name__ == "__main__":
    key = jax.random.PRNGKey(0)
    k_feat, k_param = jax.random.split(key)

    # Small shapes: 64 nodes, input_dim=32, hidden_dim=32, output_dim=16,
    # num_layers=3 (Linear->ReLU->Linear->ReLU->Linear).
    N, IN, HID, OUT, L = 64, 32, 32, 16, 3
    feats = jax.random.normal(k_feat, (N, IN), jnp.float32)

    mlp = PallasMLP(num_layers=L, input_dim=IN, hidden_dim=HID,
                    output_dim=OUT, key=k_param)
    out = mlp(feats)
    jax.block_until_ready(out)

    # Reference in plain JAX with matching bf16-input / f32-accumulate matmuls.
    h_ref = feats
    for l, (w, b) in enumerate(mlp.params):
        h_ref = jnp.dot(h_ref.astype(jnp.bfloat16), w.astype(jnp.bfloat16),
                        preferred_element_type=jnp.float32) + b
        if l != L - 1:
            h_ref = jnp.maximum(h_ref, 0.0)

    assert out.shape == (N, OUT)
    assert out.dtype == feats.dtype
    assert jnp.allclose(out, h_ref, atol=2e-3, rtol=2e-3), (
        float(jnp.max(jnp.abs(out - h_ref))))

    print("KERNEL_OK")
</pallas_src>

<mosaic_0001>
module attributes {stable_mosaic.version = 11 : i64} {
  func.func @_fused_mlp_kernel(%arg0: i32, %arg1: memref<128x128xbf16, #tpu.memory_space<vmem>>, %arg2: memref<128x128xbf16, #tpu.memory_space<vmem>>, %arg3: memref<128x128xbf16, #tpu.memory_space<vmem>>, %arg4: memref<128x128xbf16, #tpu.memory_space<vmem>>, %arg5: memref<1x128xf32, #tpu.memory_space<vmem>>, %arg6: memref<1x128xf32, #tpu.memory_space<vmem>>, %arg7: memref<1x128xf32, #tpu.memory_space<vmem>>, %arg8: memref<128x128xf32, #tpu.memory_space<vmem>>) attributes {dimension_semantics = [#tpu.dimension_semantics<parallel>], iteration_bounds = array<i64: 1>, scalar_prefetch = 0 : i64, scratch_operands = 0 : i64, tpu.core_type = #tpu.core_type<tc>, window_params = [{transform_indices = @transform_0, window_bounds = array<i64: 128, 128>}, {pipeline_mode = #tpu.pipeline_mode<synchronous>, transform_indices = @transform_1, window_bounds = array<i64: 128, 128>}, {pipeline_mode = #tpu.pipeline_mode<synchronous>, transform_indices = @transform_2, window_bounds = array<i64: 128, 128>}, {pipeline_mode = #tpu.pipeline_mode<synchronous>, transform_indices = @transform_3, window_bounds = array<i64: 128, 128>}, {pipeline_mode = #tpu.pipeline_mode<synchronous>, transform_indices = @transform_4, window_bounds = array<i64: 1, 128>}, {pipeline_mode = #tpu.pipeline_mode<synchronous>, transform_indices = @transform_5, window_bounds = array<i64: 1, 128>}, {pipeline_mode = #tpu.pipeline_mode<synchronous>, transform_indices = @transform_6, window_bounds = array<i64: 1, 128>}, {transform_indices = @transform_7, window_bounds = array<i64: 128, 128>}]} {
    %c0 = arith.constant 0 : index
    %c0_0 = arith.constant 0 : index
    %0 = vector.load %arg1[%c0, %c0_0] : memref<128x128xbf16, #tpu.memory_space<vmem>>, vector<128x128xbf16>
    %c0_1 = arith.constant 0 : index
    %c0_2 = arith.constant 0 : index
    %1 = vector.load %arg2[%c0_1, %c0_2] : memref<128x128xbf16, #tpu.memory_space<vmem>>, vector<128x128xbf16>
    %cst = arith.constant dense<0.000000e+00> : vector<128x128xf32>
    %2 = tpu.matmul %0, %1, %cst {dimension_numbers = #tpu.dot_dimension_numbers<[1], [0], [0], [1], [0, 0, 1, 1], [], []>} : vector<128x128xbf16>, vector<128x128xbf16>, vector<128x128xf32> -> vector<128x128xf32>
    %c0_3 = arith.constant 0 : index
    %c0_4 = arith.constant 0 : index
    %3 = vector.load %arg5[%c0_3, %c0_4] : memref<1x128xf32, #tpu.memory_space<vmem>>, vector<1x128xf32>
    %4 = vector.broadcast %3 : vector<1x128xf32> to vector<128x128xf32>
    %5 = arith.addf %2, %4 : vector<128x128xf32>
    %cst_5 = arith.constant 0.000000e+00 : f32
    %6 = vector.broadcast %cst_5 : f32 to vector<128x128xf32>
    %7 = arith.maximumf %5, %6 : vector<128x128xf32>
    %8 = arith.truncf %7 : vector<128x128xf32> to vector<128x128xbf16>
    %c0_6 = arith.constant 0 : index
    %c0_7 = arith.constant 0 : index
    %9 = vector.load %arg3[%c0_6, %c0_7] : memref<128x128xbf16, #tpu.memory_space<vmem>>, vector<128x128xbf16>
    %cst_8 = arith.constant dense<0.000000e+00> : vector<128x128xf32>
    %10 = tpu.matmul %8, %9, %cst_8 {dimension_numbers = #tpu.dot_dimension_numbers<[1], [0], [0], [1], [0, 0, 1, 1], [], []>} : vector<128x128xbf16>, vector<128x128xbf16>, vector<128x128xf32> -> vector<128x128xf32>
    %c0_9 = arith.constant 0 : index
    %c0_10 = arith.constant 0 : index
    %11 = vector.load %arg6[%c0_9, %c0_10] : memref<1x128xf32, #tpu.memory_space<vmem>>, vector<1x128xf32>
    %12 = vector.broadcast %11 : vector<1x128xf32> to vector<128x128xf32>
    %13 = arith.addf %10, %12 : vector<128x128xf32>
    %cst_11 = arith.constant 0.000000e+00 : f32
    %14 = vector.broadcast %cst_11 : f32 to vector<128x128xf32>
    %15 = arith.maximumf %13, %14 : vector<128x128xf32>
    %16 = arith.truncf %15 : vector<128x128xf32> to vector<128x128xbf16>
    %c0_12 = arith.constant 0 : index
    %c0_13 = arith.constant 0 : index
    %17 = vector.load %arg4[%c0_12, %c0_13] : memref<128x128xbf16, #tpu.memory_space<vmem>>, vector<128x128xbf16>
    %cst_14 = arith.constant dense<0.000000e+00> : vector<128x128xf32>
    %18 = tpu.matmul %16, %17, %cst_14 {dimension_numbers = #tpu.dot_dimension_numbers<[1], [0], [0], [1], [0, 0, 1, 1], [], []>} : vector<128x128xbf16>, vector<128x128xbf16>, vector<128x128xf32> -> vector<128x128xf32>
    %c0_15 = arith.constant 0 : index
    %c0_16 = arith.constant 0 : index
    %19 = vector.load %arg7[%c0_15, %c0_16] : memref<1x128xf32, #tpu.memory_space<vmem>>, vector<1x128xf32>
    %20 = vector.broadcast %19 : vector<1x128xf32> to vector<128x128xf32>
    %21 = arith.addf %18, %20 : vector<128x128xf32>
    %c0_17 = arith.constant 0 : index
    %c0_18 = arith.constant 0 : index
    %22 = vector.load %arg8[%c0_17, %c0_18] : memref<128x128xf32, #tpu.memory_space<vmem>>, vector<128x128xf32>
    tpu.vector_store %arg8[%c0_17, %c0_18], %21 {strides = array<i32>} : memref<128x128xf32, #tpu.memory_space<vmem>>, vector<128x128xf32>,
    return
  }
  func.func @transform_0(%arg0: i32) -> (i32, i32) {
    %c0_i32 = arith.constant 0 : i32
    %c0_i32_0 = arith.constant 0 : i32
    return %arg0, %c0_i32 : i32, i32
  }
  func.func @transform_1(%arg0: i32) -> (i32, i32) {
    %c0_i32 = arith.constant 0 : i32
    %c0_i32_0 = arith.constant 0 : i32
    %c0_i32_1 = arith.constant 0 : i32
    return %c0_i32, %c0_i32_0 : i32, i32
  }
  func.func @transform_2(%arg0: i32) -> (i32, i32) {
    %c0_i32 = arith.constant 0 : i32
    %c0_i32_0 = arith.constant 0 : i32
    %c0_i32_1 = arith.constant 0 : i32
    return %c0_i32, %c0_i32_0 : i32, i32
  }
  func.func @transform_3(%arg0: i32) -> (i32, i32) {
    %c0_i32 = arith.constant 0 : i32
    %c0_i32_0 = arith.constant 0 : i32
    %c0_i32_1 = arith.constant 0 : i32
    return %c0_i32, %c0_i32_0 : i32, i32
  }
  func.func @transform_4(%arg0: i32) -> (i32, i32) {
    %c0_i32 = arith.constant 0 : i32
    %c0_i32_0 = arith.constant 0 : i32
    %c0_i32_1 = arith.constant 0 : i32
    return %c0_i32, %c0_i32_0 : i32, i32
  }
  func.func @transform_5(%arg0: i32) -> (i32, i32) {
    %c0_i32 = arith.constant 0 : i32
    %c0_i32_0 = arith.constant 0 : i32
    %c0_i32_1 = arith.constant 0 : i32
    return %c0_i32, %c0_i32_0 : i32, i32
  }
  func.func @transform_6(%arg0: i32) -> (i32, i32) {
    %c0_i32 = arith.constant 0 : i32
    %c0_i32_0 = arith.constant 0 : i32
    %c0_i32_1 = arith.constant 0 : i32
    return %c0_i32, %c0_i32_0 : i32, i32
  }
  func.func @transform_7(%arg0: i32) -> (i32, i32) {
    %c0_i32 = arith.constant 0 : i32
    %c0_i32_0 = arith.constant 0 : i32
    return %arg0, %c0_i32 : i32, i32
  }
}

</mosaic_0001>

<bundles_post_ra>
// kernel: fused_mlp_forward.1
= control target key start
LH: loop header
LB: loop body
LE: loop exit
PB: predicated region body
PF: predicated region fallthrough
CT: control target
= control target key end

     0   :  { %s1119_s1 = inlined_call_operand.vmem [shape: bf16[128,128], index: 1, kind: input, shape index: {}]   ;;  %s1120_s0 = inlined_call_operand.vmem [shape: bf16[128,128], index: 0, kind: input, shape index: {}]   ;;  %s1121_s2 = inlined_call_operand.vmem [shape: bf16[128,128], index: 2, kind: input, shape index: {}]   ;;  %s1122_s3 = inlined_call_operand.vmem [shape: bf16[128,128], index: 3, kind: input, shape index: {}]   ;;  %s1123_s4 = inlined_call_operand.vmem [shape: f32[1,128], index: 4, kind: input, shape index: {}]   ;;  %s1124_s5 = inlined_call_operand.vmem [shape: f32[1,128], index: 5, kind: input, shape index: {}]   ;;  %s1125_s6 = inlined_call_operand.vmem [shape: f32[1,128], index: 6, kind: input, shape index: {}]   ;;  %s1126_s7 = inlined_call_operand.vmem [shape: f32[128,128], index: 7, kind: output, shape index: {}]  }
   0x1   :  { %v858_v0 = vld [vmem:[%s1119_s1] sm:$0xff]   ;;  %v859_v1 = vld [vmem:[%s1119_s1 + $0x8] sm:$0xff]   ;;  %v860_v2 = vld [vmem:[%s1119_s1 + $0x10] sm:$0xff]  }
   0x2   :  { %746 = vmatprep.subr.bf16.mxu0 %v858_v0  ;;  %v861_v3 = vld [vmem:[%s1119_s1 + $0x18] sm:$0xff]   ;;  %v866_v4 = vld [vmem:[%s1120_s0] sm:$0xff]   ;;  %v863_v6 = vld [vmem:[%s1119_s1 + $0x28] sm:$0xff]  }
   0x3   :  { %747 = vmatpush3.bf16.msra.mxu0 %v858_v0  ;;  %762 = vmatprep.mubr.bf16.mxu0 %v866_v4  ;;  %v862_v5 = vld [vmem:[%s1119_s1 + $0x20] sm:$0xff]   ;;  %v875_v8 = vld [vmem:[%s1121_s2 + $0x8] sm:$0xff]   ;;  %v864_v9 = vld [vmem:[%s1119_s1 + $0x30] sm:$0xff]  }
   0x4   :  { %748 = vmatprep.subr.bf16.mxu0 %v859_v1  ;;  %v874_v7 = vld [vmem:[%s1121_s2] sm:$0xff]   ;;  %v876_v10 = vld [vmem:[%s1121_s2 + $0x10] sm:$0xff]   ;;  %v865_v11 = vld [vmem:[%s1119_s1 + $0x38] sm:$0xff]  }
   0x5   :  { %778 = vmatprep.subr.bf16.mxu1 %v874_v7  ;;  %v877_v12 = vld [vmem:[%s1121_s2 + $0x18] sm:$0xff]   ;;  %v878_v13 = vld [vmem:[%s1121_s2 + $0x20] sm:$0xff]   ;;  %v867_v14 = vld [vmem:[%s1120_s0 + $0x8] sm:$0xff]  }
   0x6   :  { %779 = vmatpush3.bf16.msra.mxu1 %v874_v7  ;;  %v868_v15 = vld [vmem:[%s1120_s0 + $0x10] sm:$0xff]   ;;  %v879_v16 = vld [vmem:[%s1121_s2 + $0x28] sm:$0xff]   ;;  %v869_v17 = vld [vmem:[%s1120_s0 + $0x18] sm:$0xff]  }
   0x7   :  { %749 = vmatpush3.bf16.msra.mxu0 %v859_v1  ;;  %780 = vmatprep.subr.bf16.mxu1 %v875_v8  ;;  %v870_v18 = vld [vmem:[%s1120_s0 + $0x20] sm:$0xff]   ;;  %v871_v19 = vld [vmem:[%s1120_s0 + $0x28] sm:$0xff]   ;;  %v872_v20 = vld [vmem:[%s1120_s0 + $0x30] sm:$0xff]  }
   0x8   :  { %750 = vmatprep.subr.bf16.mxu0 %v860_v2  ;;  %v873_v21 = vld [vmem:[%s1120_s0 + $0x38] sm:$0xff]   ;;  %v880_v22 = vld [vmem:[%s1121_s2 + $0x30] sm:$0xff]   ;;  %v882_v24 = vld [vmem:[%s1122_s3] sm:$0xff]  }
   0x9   :  { %v881_v23 = vld [vmem:[%s1121_s2 + $0x38] sm:$0xff]   ;;  %v883_v25 = vld [vmem:[%s1122_s3 + $0x8] sm:$0xff]   ;;  %v884_v26 = vld [vmem:[%s1122_s3 + $0x10] sm:$0xff]  }
   0xa   :  { %781 = vmatpush3.bf16.msra.mxu1 %v875_v8  ;;  %v1014_v27 = vld [vmem:[%s1122_s3 + $0x18] sm:$0xff]   ;;  %v1020_v28 = vld [vmem:[%s1122_s3 + $0x20] sm:$0xff]   ;;  %v1027_v29 = vld [vmem:[%s1122_s3 + $0x28] sm:$0xff]  }
   0xb   :  { %751 = vmatpush3.bf16.msra.mxu0 %v860_v2  ;;  %782 = vmatprep.subr.bf16.mxu1 %v876_v10  ;;  %v1035_v30 = vld [vmem:[%s1123_s4] ss:$0 sm:$0xff] }
   0xc   :  { %752 = vmatprep.subr.bf16.mxu0 %v861_v3 }
   0xe   :  { %783 = vmatpush3.bf16.msra.mxu1 %v876_v10 }
   0xf   :  { %753 = vmatpush3.bf16.msra.mxu0 %v861_v3  ;;  %784 = vmatprep.subr.bf16.mxu1 %v877_v12 }
  0x10   :  { %754 = vmatprep.subr.bf16.mxu0 %v862_v5 }
  0x12   :  { %785 = vmatpush3.bf16.msra.mxu1 %v877_v12 }
  0x13   :  { %755 = vmatpush3.bf16.msra.mxu0 %v862_v5  ;;  %786 = vmatprep.subr.bf16.mxu1 %v878_v13 }
  0x14   :  { %756 = vmatprep.subr.bf16.mxu0 %v863_v6 }
  0x16   :  { %787 = vmatpush3.bf16.msra.mxu1 %v878_v13 }
  0x17   :  { %757 = vmatpush3.bf16.msra.mxu0 %v863_v6  ;;  %788 = vmatprep.subr.bf16.mxu1 %v879_v16 }
  0x18   :  { %758 = vmatprep.subr.bf16.mxu0 %v864_v9 }
  0x1a   :  { %789 = vmatpush3.bf16.msra.mxu1 %v879_v16 }
  0x1b   :  { %759 = vmatpush3.bf16.msra.mxu0 %v864_v9  ;;  %790 = vmatprep.subr.bf16.mxu1 %v880_v22 }
  0x1c   :  { %760 = vmatprep.subr.bf16.mxu0 %v865_v11 }
  0x1e   :  { %791 = vmatpush3.bf16.msra.mxu1 %v880_v22 }
  0x1f   :  { %761 = vmatpush3.bf16.msra.mxu0 %v865_v11  ;;  %792 = vmatprep.subr.bf16.mxu1 %v881_v23 }
  0x20   :  { %810 = vmatprep.subr.bf16.mxu0 %v882_v24 }
  0x22   :  { %763 = vmatmul.mubr.bf16.vlgmr.msra.gmra.mrb[0].mxu0 %v867_v14  ;;  %793 = vmatpush3.bf16.msra.mxu1 %v881_v23  ;;  %v888_v23 = vld [vmem:[%s1122_s3 + $0x30] sm:$0xff]  }
  0x23   :  { %766 = vmatprep.mubr.bf16.mxu0 %v868_v15  ;;  %842 = vmatprep.subr.bf16.mxu1 %v882_v24 }
  0x24   :  { %811 = vmatpush3.bf16.msra.mxu0 %v882_v24 }
  0x25   :  { %812 = vmatprep.subr.bf16.mxu0 %v883_v25 }
  0x28   :  { %813 = vmatpush3.bf16.msra.mxu0 %v883_v25 }
  0x29   :  { %814 = vmatprep.subr.bf16.mxu0 %v884_v26 }
  0x2a   :  { %767 = vmatmul.mubr.bf16.gmra.mrb[4].mxu0 %v869_v17 }
  0x2b   :  { %770 = vmatprep.mubr.bf16.mxu0 %v870_v18 }
  0x2c   :  { %815 = vmatpush3.bf16.msra.mxu0 %v884_v26 }
  0x2d   :  { %816 = vmatprep.subr.bf16.mxu0 %v1014_v27 }
  0x30   :  { %817 = vmatpush3.bf16.msra.mxu0 %v1014_v27 }
  0x31   :  { %818 = vmatprep.subr.bf16.mxu0 %v1020_v28 }
  0x32   :  { %771 = vmatmul.mubr.bf16.gmra.mrb[8].mxu0 %v871_v19 }
  0x33   :  { %774 = vmatprep.mubr.bf16.mxu0 %v872_v20 }
  0x34   :  { %819 = vmatpush3.bf16.msra.mxu0 %v1020_v28 }
  0x35   :  { %820 = vmatprep.subr.bf16.mxu0 %v1027_v29 }
  0x38   :  { %821 = vmatpush3.bf16.msra.mxu0 %v1027_v29 }
  0x39   :  { %822 = vmatprep.subr.bf16.mxu0 %v888_v23 }
  0x3a   :  { %775 = vmatmul.mubr.bf16.gmra.mrb[12].mxu0 %v873_v21 }
  0x3c   :  { %823 = vmatpush3.bf16.msra.mxu0 %v888_v23 }
  0xf5   :  { %v764_v31 = vpop.f32.mrb[0].mxu0 }
  0xf6   :  { %v205_v32 = vadd.f32 %v764_v31, %v1035_v30  ;;  %v196_v33 = vpop.f32.mrb[1].mxu0 }
  0xf7   :  { %v197_v34 = vadd.f32 %v1035_v30, %v196_v33  ;;  %v765_v35 = vpop.f32.mrb[2].mxu0 }
  0xf8   :  { %v208_v36 = vadd.f32 %v765_v35, %v1035_v30  ;;  %v199_v37 = vpop.f32.mrb[3].mxu0  ;;  %v261_v39 = vmax.f32 %v205_v32, 0.0 }
  0xf9   :  { %v200_v38 = vadd.f32 %v1035_v30, %v199_v37  ;;  %v259_v41 = vmax.f32 %v197_v34, 0.0 }
  0xfa   :  { %v262_v40 = vmax.f32 %v208_v36, 0.0 }
  0xfb   :  { %v260_v42 = vmax.f32 %v200_v38, 0.0 }
  0xfc   :  { %v276_v43 = vpack.c.bf16 %v262_v40, %v261_v39 }
  0xfd   :  { %v768_v44 = vpop.f32.mrb[4].mxu0  ;;  %v275_v45 = vpack.c.bf16 %v260_v42, %v259_v41 }
  0xfe   :  { %v221_v46 = vadd.f32 %v768_v44, %v1035_v30  ;;  %v212_v47 = vpop.f32.mrb[5].mxu0 }
  0xff   :  { %v213_v48 = vadd.f32 %v1035_v30, %v212_v47  ;;  %v769_v49 = vpop.f32.mrb[6].mxu0  ;;  %794 = vmatprep.mubr.bf16.mxu1 %v275_v45 }
 0x100   :  { %v224_v50 = vadd.f32 %v769_v49, %v1035_v30  ;;  %v215_v51 = vpop.f32.mrb[7].mxu0  ;;  %795 = vmatmul.mubr.bf16.vlgmr.msra.gmra.mrb[0].mxu1 %v276_v43  ;;  %v265_v53 = vmax.f32 %v221_v46, 0.0 }
 0x101   :  { %v216_v52 = vadd.f32 %v1035_v30, %v215_v51  ;;  %850 = vmatpush3.bf16.msra.mxu1 %v882_v24  ;;  %v263_v55 = vmax.f32 %v213_v48, 0.0  ;;  %v889_v24 = vld [vmem:[%s1122_s3 + $0x38] sm:$0xff]  }
 0x102   :  { %v266_v54 = vmax.f32 %v224_v50, 0.0  ;;  %843 = vmatprep.subr.bf16.mxu1 %v883_v25  ;;  %824 = vmatprep.subr.bf16.mxu0 %v889_v24 }
 0x103   :  { %v264_v56 = vmax.f32 %v216_v52, 0.0  ;;  %825 = vmatpush3.bf16.msra.mxu0 %v889_v24 }
 0x104   :  { %v278_v57 = vpack.c.bf16 %v266_v54, %v265_v53 }
 0x105   :  { %v277_v58 = vpack.c.bf16 %v264_v56, %v263_v55  ;;  %v772_v59 = vpop.f32.mrb[8].mxu0  ;;  %851 = vmatpush3.bf16.msra.mxu1 %v883_v25  ;;  %v680_v25 = vld [vmem:[%s1124_s5] ss:$0 sm:$0xff] }
 0x106   :  { %v237_v60 = vadd.f32 %v772_v59, %v1035_v30  ;;  %v228_v61 = vpop.f32.mrb[9].mxu0  ;;  %844 = vmatprep.subr.bf16.mxu1 %v884_v26 }
 0x107   :  { %v229_v62 = vadd.f32 %v1035_v30, %v228_v61  ;;  %v773_v63 = vpop.f32.mrb[10].mxu0  ;;  %798 = vmatprep.mubr.bf16.mxu1 %v277_v58 }
 0x108   :  { %v240_v0 = vadd.f32 %v773_v63, %v1035_v30  ;;  %v231_v1 = vpop.f32.mrb[11].mxu0  ;;  %799 = vmatmul.mubr.bf16.gmra.mrb[4].mxu1 %v278_v57  ;;  %v269_v3 = vmax.f32 %v237_v60, 0.0 }
 0x109   :  { %v232_v2 = vadd.f32 %v1035_v30, %v231_v1  ;;  %852 = vmatpush3.bf16.msra.mxu1 %v884_v26  ;;  %v267_v5 = vmax.f32 %v229_v62, 0.0 }
 0x10a   :  { %v270_v4 = vmax.f32 %v240_v0, 0.0  ;;  %845 = vmatprep.subr.bf16.mxu1 %v1014_v27 }
 0x10b   :  { %v268_v6 = vmax.f32 %v232_v2, 0.0 }
 0x10c   :  { %v280_v7 = vpack.c.bf16 %v270_v4, %v269_v3 }
 0x10d   :  { %v279_v8 = vpack.c.bf16 %v268_v6, %v267_v5  ;;  %v776_v9 = vpop.f32.mrb[12].mxu0  ;;  %853 = vmatpush3.bf16.msra.mxu1 %v1014_v27 }
 0x10e   :  { %v253_v10 = vadd.f32 %v776_v9, %v1035_v30  ;;  %v244_v11 = vpop.f32.mrb[13].mxu0  ;;  %846 = vmatprep.subr.bf16.mxu1 %v1020_v28 }
 0x10f   :  { %v245_v12 = vadd.f32 %v1035_v30, %v244_v11  ;;  %v777_v13 = vpop.f32.mrb[14].mxu0  ;;  %802 = vmatprep.mubr.bf16.mxu1 %v279_v8 }
 0x110   :  { %v256_v14 = vadd.f32 %v777_v13, %v1035_v30  ;;  %v247_v15 = vpop.f32.mrb[15].mxu0  ;;  %803 = vmatmul.mubr.bf16.gmra.mrb[8].mxu1 %v280_v7  ;;  %v273_v17 = vmax.f32 %v253_v10, 0.0 }
 0x111   :  { %v248_v16 = vadd.f32 %v1035_v30, %v247_v15  ;;  %854 = vmatpush3.bf16.msra.mxu1 %v1020_v28  ;;  %v271_v19 = vmax.f32 %v245_v12, 0.0 }
 0x112   :  { %v274_v18 = vmax.f32 %v256_v14, 0.0  ;;  %847 = vmatprep.subr.bf16.mxu1 %v1027_v29 }
 0x113   :  { %v272_v20 = vmax.f32 %v248_v16, 0.0 }
 0x114   :  { %v282_v21 = vpack.c.bf16 %v274_v18, %v273_v17  ;;  %v689_v18 = vld [vmem:[%s1125_s6] ss:$0 sm:$0xff] }
 0x115   :  { %v281_v22 = vpack.c.bf16 %v272_v20, %v271_v19  ;;  %855 = vmatpush3.bf16.msra.mxu1 %v1027_v29 }
 0x116   :  { %848 = vmatprep.subr.bf16.mxu1 %v888_v23 }
 0x117   :  { %806 = vmatprep.mubr.bf16.mxu1 %v281_v22 }
 0x118   :  { %807 = vmatmul.mubr.bf16.gmra.mrb[12].mxu1 %v282_v21 }
 0x119   :  { %856 = vmatpush3.bf16.msra.mxu1 %v888_v23 }
 0x11a   :  { %849 = vmatprep.subr.bf16.mxu1 %v889_v24 }
 0x11d   :  { %857 = vmatpush3.bf16.msra.mxu1 %v889_v24 }
 0x1d3   :  { %v796_v26 = vpop.f32.mrb[0].mxu1 }
 0x1d4   :  { %v397_v27 = vadd.f32 %v796_v26, %v680_v25  ;;  %v388_v28 = vpop.f32.mrb[1].mxu1 }
 0x1d5   :  { %v389_v29 = vadd.f32 %v680_v25, %v388_v28  ;;  %v797_v30 = vpop.f32.mrb[2].mxu1 }
 0x1d6   :  { %v400_v31 = vadd.f32 %v797_v30, %v680_v25  ;;  %v391_v32 = vpop.f32.mrb[3].mxu1  ;;  %v453_v34 = vmax.f32 %v397_v27, 0.0 }
 0x1d7   :  { %v392_v33 = vadd.f32 %v680_v25, %v391_v32  ;;  %v451_v36 = vmax.f32 %v389_v29, 0.0 }
 0x1d8   :  { %v454_v35 = vmax.f32 %v400_v31, 0.0 }
 0x1d9   :  { %v452_v37 = vmax.f32 %v392_v33, 0.0 }
 0x1da   :  { %v468_v38 = vpack.c.bf16 %v454_v35, %v453_v34 }
 0x1db   :  { %v467_v39 = vpack.c.bf16 %v452_v37, %v451_v36  ;;  %v800_v40 = vpop.f32.mrb[4].mxu1 }
 0x1dc   :  { %v413_v41 = vadd.f32 %v800_v40, %v680_v25  ;;  %v404_v42 = vpop.f32.mrb[5].mxu1 }
 0x1dd   :  { %v405_v43 = vadd.f32 %v680_v25, %v404_v42  ;;  %v801_v44 = vpop.f32.mrb[6].mxu1  ;;  %826 = vmatprep.mubr.bf16.mxu0 %v467_v39 }
 0x1de   :  { %v416_v45 = vadd.f32 %v801_v44, %v680_v25  ;;  %v407_v46 = vpop.f32.mrb[7].mxu1  ;;  %827 = vmatmul.mubr.bf16.vlgmr.msra.gmra.mrb[16].mxu0 %v468_v38  ;;  %v457_v48 = vmax.f32 %v413_v41, 0.0 }
 0x1df   :  { %v408_v47 = vadd.f32 %v680_v25, %v407_v46  ;;  %v455_v50 = vmax.f32 %v405_v43, 0.0 }
 0x1e0   :  { %v458_v49 = vmax.f32 %v416_v45, 0.0 }
 0x1e1   :  { %v456_v51 = vmax.f32 %v408_v47, 0.0 }
 0x1e2   :  { %v470_v52 = vpack.c.bf16 %v458_v49, %v457_v48 }
 0x1e3   :  { %v469_v53 = vpack.c.bf16 %v456_v51, %v455_v50  ;;  %v804_v54 = vpop.f32.mrb[8].mxu1 }
 0x1e4   :  { %v429_v55 = vadd.f32 %v804_v54, %v680_v25  ;;  %v420_v56 = vpop.f32.mrb[9].mxu1 }
 0x1e5   :  { %v421_v57 = vadd.f32 %v680_v25, %v420_v56  ;;  %v805_v58 = vpop.f32.mrb[10].mxu1  ;;  %830 = vmatprep.mubr.bf16.mxu0 %v469_v53 }
 0x1e6   :  { %v432_v59 = vadd.f32 %v805_v58, %v680_v25  ;;  %v423_v60 = vpop.f32.mrb[11].mxu1  ;;  %831 = vmatmul.mubr.bf16.gmra.mrb[20].mxu0 %v470_v52  ;;  %v461_v62 = vmax.f32 %v429_v55, 0.0 }
 0x1e7   :  { %v424_v61 = vadd.f32 %v680_v25, %v423_v60  ;;  %v459_v0 = vmax.f32 %v421_v57, 0.0 }
 0x1e8   :  { %v462_v63 = vmax.f32 %v432_v59, 0.0 }
 0x1e9   :  { %v460_v1 = vmax.f32 %v424_v61, 0.0 }
 0x1ea   :  { %v472_v2 = vpack.c.bf16 %v462_v63, %v461_v62 }
 0x1eb   :  { %v471_v3 = vpack.c.bf16 %v460_v1, %v459_v0  ;;  %v808_v4 = vpop.f32.mrb[12].mxu1 }
 0x1ec   :  { %v445_v5 = vadd.f32 %v808_v4, %v680_v25  ;;  %v436_v6 = vpop.f32.mrb[13].mxu1 }
 0x1ed   :  { %v437_v7 = vadd.f32 %v680_v25, %v436_v6  ;;  %v809_v8 = vpop.f32.mrb[14].mxu1  ;;  %834 = vmatprep.mubr.bf16.mxu1 %v471_v3 }
 0x1ee   :  { %v448_v9 = vadd.f32 %v809_v8, %v680_v25  ;;  %v439_v10 = vpop.f32.mrb[15].mxu1  ;;  %835 = vmatmul.mubr.bf16.vlgmr.msra.gmra.mrb[16].mxu1 %v472_v2  ;;  %v465_v12 = vmax.f32 %v445_v5, 0.0 }
 0x1ef   :  { %v440_v11 = vadd.f32 %v680_v25, %v439_v10  ;;  %v463_v14 = vmax.f32 %v437_v7, 0.0 }
 0x1f0   :  { %v466_v13 = vmax.f32 %v448_v9, 0.0 }
 0x1f1   :  { %v464_v15 = vmax.f32 %v440_v11, 0.0 }
 0x1f2   :  { %v474_v16 = vpack.c.bf16 %v466_v13, %v465_v12 }
 0x1f3   :  { %v473_v17 = vpack.c.bf16 %v464_v15, %v463_v14 }
 0x1f5   :  { %838 = vmatprep.mubr.bf16.mxu1 %v473_v17 }
 0x1f6   :  { %839 = vmatmul.mubr.bf16.gmra.mrb[20].mxu1 %v474_v16 }
 0x2b1   :  { %v828_v19 = vpop.f32.mrb[16].mxu0 }
 0x2b2   :  { %v589_v20 = vadd.f32 %v828_v19, %v689_v18  ;;  %v580_v21 = vpop.f32.mrb[17].mxu0 }
 0x2b3   :  { %v581_v22 = vadd.f32 %v689_v18, %v580_v21  ;;  %v829_v23 = vpop.f32.mrb[18].mxu0 }
 0x2b4   :  { %645 = vst [vmem:[%s1126_s7 + $0x10] sm:$0xff] %v589_v20  ;;  %v592_v24 = vadd.f32 %v829_v23, %v689_v18  ;;  %v583_v25 = vpop.f32.mrb[19].mxu0 }
 0x2b5   :  { %643 = vst [vmem:[%s1126_s7] sm:$0xff] %v581_v22  ;;  %v584_v26 = vadd.f32 %v689_v18, %v583_v25 }
 0x2b6   :  { %646 = vst [vmem:[%s1126_s7 + $0x18] sm:$0xff] %v592_v24 }
 0x2b7   :  { %644 = vst [vmem:[%s1126_s7 + $0x8] sm:$0xff] %v584_v26 }
 0x2b9   :  { %v832_v27 = vpop.f32.mrb[20].mxu0 }
 0x2ba   :  { %v605_v28 = vadd.f32 %v832_v27, %v689_v18  ;;  %v596_v29 = vpop.f32.mrb[21].mxu0 }
 0x2bb   :  { %v597_v30 = vadd.f32 %v689_v18, %v596_v29  ;;  %v833_v31 = vpop.f32.mrb[22].mxu0 }
 0x2bc   :  { %649 = vst [vmem:[%s1126_s7 + $0x30] sm:$0xff] %v605_v28  ;;  %v608_v32 = vadd.f32 %v833_v31, %v689_v18  ;;  %v599_v33 = vpop.f32.mrb[23].mxu0 }
 0x2bd   :  { %647 = vst [vmem:[%s1126_s7 + $0x20] sm:$0xff] %v597_v30  ;;  %v600_v34 = vadd.f32 %v689_v18, %v599_v33 }
 0x2be   :  { %650 = vst [vmem:[%s1126_s7 + $0x38] sm:$0xff] %v608_v32 }
 0x2bf   :  { %648 = vst [vmem:[%s1126_s7 + $0x28] sm:$0xff] %v600_v34 }
 0x2c1   :  { %v836_v35 = vpop.f32.mrb[16].mxu1 }
 0x2c2   :  { %v621_v36 = vadd.f32 %v836_v35, %v689_v18  ;;  %v612_v37 = vpop.f32.mrb[17].mxu1 }
 0x2c3   :  { %v613_v38 = vadd.f32 %v689_v18, %v612_v37  ;;  %v837_v39 = vpop.f32.mrb[18].mxu1 }
 0x2c4   :  { %653 = vst [vmem:[%s1126_s7 + $0x50] sm:$0xff] %v621_v36  ;;  %v624_v40 = vadd.f32 %v837_v39, %v689_v18  ;;  %v615_v41 = vpop.f32.mrb[19].mxu1 }
 0x2c5   :  { %651 = vst [vmem:[%s1126_s7 + $0x40] sm:$0xff] %v613_v38  ;;  %v616_v42 = vadd.f32 %v689_v18, %v615_v41 }
 0x2c6   :  { %654 = vst [vmem:[%s1126_s7 + $0x58] sm:$0xff] %v624_v40 }
 0x2c7   :  { %652 = vst [vmem:[%s1126_s7 + $0x48] sm:$0xff] %v616_v42 }
 0x2c9   :  { %v840_v43 = vpop.f32.mrb[20].mxu1 }
 0x2ca   :  { %v637_v44 = vadd.f32 %v840_v43, %v689_v18  ;;  %v628_v45 = vpop.f32.mrb[21].mxu1 }
 0x2cb   :  { %v629_v46 = vadd.f32 %v689_v18, %v628_v45  ;;  %v841_v47 = vpop.f32.mrb[22].mxu1 }
 0x2cc   :  { %657 = vst [vmem:[%s1126_s7 + $0x70] sm:$0xff] %v637_v44  ;;  %v640_v48 = vadd.f32 %v841_v47, %v689_v18  ;;  %v631_v49 = vpop.f32.mrb[23].mxu1 }
 0x2cd   :  { %655 = vst [vmem:[%s1126_s7 + $0x60] sm:$0xff] %v629_v46  ;;  %v632_v50 = vadd.f32 %v689_v18, %v631_v49 }
 0x2ce   :  { %658 = vst [vmem:[%s1126_s7 + $0x78] sm:$0xff] %v640_v48 }
 0x2cf   :  { %656 = vst [vmem:[%s1126_s7 + $0x68] sm:$0xff] %v632_v50 }

</bundles_post_ra>
